<compile_context>
chip_gen: v5e
topology: v5e:2x2
jax: 0.10.0
libtpu: 0.0.40
codegen_flags: <defaults>
</compile_context>

<pallas_src>
import math
import numpy as np

import jax
import jax.numpy as jnp
from jax import lax
from jax.experimental import pallas as pl
from jax.experimental.pallas import tpu as pltpu


# ----------------------------- Pallas kernel -----------------------------

def _bdc_pool_kernel(scale_ref, x_ref, o_ref):
    """Fused BDCovpool for one batch element.

    scale_ref : SMEM (1, 1) f32  -- exp(temperature)
    x_ref     : VMEM (1, C, M)   -- flattened activations for this batch
    o_ref     : VMEM (1, C, C)   -- double-centered distance matrix
    """
    x = x_ref[0]                                      # (C, M)
    dim = x.shape[0]

    # Gram matrix on the MXU: G[i, j] = sum_m x[i, m] * x[j, m]  (NT matmul)
    g = lax.dot_general(x, x, (((1,), (1,)), ((), ())),
                        preferred_element_type=jnp.float32)       # (C, C)

    # diag(G) broadcast along rows / columns via masked reductions (no transposes)
    ii = lax.broadcasted_iota(jnp.int32, (dim, dim), 0)
    jj = lax.broadcasted_iota(jnp.int32, (dim, dim), 1)
    g_diag = jnp.where(ii == jj, g, 0.0)
    d_col = jnp.sum(g_diag, axis=1, keepdims=True)                # (C, 1): G[i,i]
    d_row = jnp.sum(g_diag, axis=0, keepdims=True)                # (1, C): G[j,j]

    # squared pairwise distances, clamp, temperature scale, sqrt
    dcov = jnp.maximum(d_col + d_row - 2.0 * g, 0.0)
    dcov = jnp.sqrt(dcov * scale_ref[0, 0] + 1e-5)

    # double centering: out = dcov - rowmean_i - colmean_j + grandmean
    inv_dim = 1.0 / dim
    r = jnp.sum(dcov, axis=1, keepdims=True) * inv_dim            # (C, 1)
    c = jnp.sum(dcov, axis=0, keepdims=True) * inv_dim            # (1, C)
    gmean = jnp.sum(c, axis=1, keepdims=True) * inv_dim           # (1, 1)
    o_ref[0] = dcov - r - c + gmean


# ----------------------------- wrappers -----------------------------

def bdc_covpool(x_nchw, temperature):
    """BDCovpool(x, t) via one fused pallas_call; returns (B, C, C)."""
    B, C, H, W = x_nchw.shape
    M = H * W
    x3 = x_nchw.reshape(B, C, M).astype(jnp.float32)
    scale = jnp.exp(temperature).reshape(1, 1).astype(jnp.float32)
    return pl.pallas_call(
        _bdc_pool_kernel,
        out_shape=jax.ShapeDtypeStruct((B, C, C), jnp.float32),
        grid=(B,),
        in_specs=[
            pl.BlockSpec(memory_space=pltpu.MemorySpace.SMEM),    # exp(t) scalar
            pl.BlockSpec((1, C, M), lambda b: (b, 0, 0)),
        ],
        out_specs=pl.BlockSpec((1, C, C), lambda b: (b, 0, 0)),
        compiler_params=pltpu.CompilerParams(
            dimension_semantics=("parallel",)),
    )(scale, x3)


def _triu_flat_indices(dim):
    # Same ordering as torch: ones(dim,dim).triu().reshape(-1).nonzero()
    mask = np.triu(np.ones((dim, dim), dtype=bool)).reshape(-1)
    return np.nonzero(mask)[0]


def bdc_forward(x_nchw, temperature, is_vec=True):
    """BDC.forward for the default dr=None configuration."""
    B, C = x_nchw.shape[0], x_nchw.shape[1]
    mat = bdc_covpool(x_nchw, temperature)
    flat = mat.reshape(B, C * C)
    if is_vec:
        return flat[:, _triu_flat_indices(C)]                     # Triuvec
    return flat


# ----------------------------- pure-JAX reference -----------------------------

def ref_forward(x_nchw, temperature, is_vec=True):
    B, C, H, W = x_nchw.shape
    M = H * W
    x = x_nchw.reshape(B, C, M).astype(jnp.float32)
    g = jnp.einsum('bim,bjm->bij', x, x)
    d = jnp.diagonal(g, axis1=1, axis2=2)                         # (B, C)
    dcov = d[:, :, None] + d[:, None, :] - 2.0 * g
    dcov = jnp.maximum(dcov, 0.0)
    dcov = jnp.exp(temperature) * dcov
    dcov = jnp.sqrt(dcov + 1e-5)
    r = jnp.mean(dcov, axis=2, keepdims=True)
    c = jnp.mean(dcov, axis=1, keepdims=True)
    gm = jnp.mean(dcov, axis=(1, 2), keepdims=True)
    out = dcov - r - c + gm
    flat = out.reshape(B, C * C)
    if is_vec:
        return flat[:, _triu_flat_indices(C)]
    return flat


# ----------------------------- main -----------------------------

if __name__ == "__main__":
    key = jax.random.PRNGKey(0)

    # BDC(is_vec=True, input_dim=(C, H, W), dimension_reduction=None)
    B, C, H, W = 2, 128, 8, 8
    x = jax.random.normal(key, (B, C, H, W), jnp.float32)

    # nn.Parameter init: temperature = log(1 / (2 * H * W)) * ones(1, 1)
    temperature = jnp.full((1, 1), math.log(1.0 / (2.0 * H * W)), jnp.float32)

    out = jax.block_until_ready(bdc_forward(x, temperature, is_vec=True))
    ref = jax.block_until_ready(ref_forward(x, temperature, is_vec=True))

    assert out.shape == (B, C * (C + 1) // 2), out.shape
    assert out.shape == ref.shape, (out.shape, ref.shape)
    max_err = float(jnp.max(jnp.abs(out - ref)))
    assert jnp.allclose(out, ref, rtol=2e-2, atol=2e-2), max_err

    print("KERNEL_OK")
</pallas_src>

<mosaic_0001>
module attributes {stable_mosaic.version = 11 : i64} {
  func.func @_bdc_pool_kernel(%arg0: i32, %arg1: memref<1x1xf32, #tpu.memory_space<smem>>, %arg2: memref<1x128x64xf32, #tpu.memory_space<vmem>>, %arg3: memref<1x128x128xf32, #tpu.memory_space<vmem>>) attributes {dimension_semantics = [#tpu.dimension_semantics<parallel>], iteration_bounds = array<i64: 2>, scalar_prefetch = 0 : i64, scratch_operands = 0 : i64, tpu.core_type = #tpu.core_type<tc>, window_params = [{transform_indices = @transform_0, window_bounds = array<i64: 1, 1>}, {transform_indices = @transform_1, window_bounds = array<i64: 1, 128, 64>}, {transform_indices = @transform_2, window_bounds = array<i64: 1, 128, 128>}]} {
    %c0 = arith.constant 0 : index
    %c0_0 = arith.constant 0 : index
    %c0_1 = arith.constant 0 : index
    %0 = vector.load %arg2[%c0, %c0_0, %c0_1] : memref<1x128x64xf32, #tpu.memory_space<vmem>>, vector<1x128x64xf32>
    %1 = vector.shape_cast %0 : vector<1x128x64xf32> to vector<128x64xf32>
    %cst = arith.constant dense<0.000000e+00> : vector<128x128xf32>
    %2 = tpu.matmul %1, %1, %cst {dimension_numbers = #tpu.dot_dimension_numbers<[1], [1], [0], [0], [0, 0, 1, 0], [], []>} : vector<128x64xf32>, vector<128x64xf32>, vector<128x128xf32> -> vector<128x128xf32>
    %3 = tpu.iota {dimensions = array<i32: 0>} : vector<128x128xi32>
    %4 = tpu.iota {dimensions = array<i32: 1>} : vector<128x128xi32>
    %5 = arith.cmpi eq, %3, %4 : vector<128x128xi32>
    %cst_2 = arith.constant 0.000000e+00 : f32
    %6 = vector.broadcast %cst_2 : f32 to vector<128x128xf32>
    %7 = arith.select %5, %2, %6 : vector<128x128xi1>, vector<128x128xf32>
    %cst_3 = arith.constant dense<0.000000e+00> : vector<128xf32>
    %8 = vector.multi_reduction <add>, %7, %cst_3 [1] : vector<128x128xf32> to vector<128xf32>
    %9 = vector.shape_cast %8 : vector<128xf32> to vector<128x1xf32>
    %cst_4 = arith.constant dense<0.000000e+00> : vector<128xf32>
    %10 = vector.multi_reduction <add>, %7, %cst_4 [0] : vector<128x128xf32> to vector<128xf32>
    %11 = vector.shape_cast %10 : vector<128xf32> to vector<1x128xf32>
    %12 = vector.broadcast %9 : vector<128x1xf32> to vector<128x128xf32>
    %13 = vector.broadcast %11 : vector<1x128xf32> to vector<128x128xf32>
    %14 = arith.addf %12, %13 : vector<128x128xf32>
    %cst_5 = arith.constant 2.000000e+00 : f32
    %15 = vector.broadcast %cst_5 : f32 to vector<128x128xf32>
    %16 = arith.mulf %15, %2 : vector<128x128xf32>
    %17 = arith.subf %14, %16 : vector<128x128xf32>
    %cst_6 = arith.constant 0.000000e+00 : f32
    %18 = vector.broadcast %cst_6 : f32 to vector<128x128xf32>
    %19 = arith.maximumf %17, %18 : vector<128x128xf32>
    %c0_7 = arith.constant 0 : index
    %c0_8 = arith.constant 0 : index
    %20 = memref.load %arg1[%c0_7, %c0_8] : memref<1x1xf32, #tpu.memory_space<smem>>
    %21 = vector.broadcast %20 : f32 to vector<128x128xf32>
    %22 = arith.mulf %19, %21 : vector<128x128xf32>
    %cst_9 = arith.constant 9.99999974E-6 : f32
    %23 = vector.broadcast %cst_9 : f32 to vector<128x128xf32>
    %24 = arith.addf %22, %23 : vector<128x128xf32>
    %25 = math.sqrt %24 : vector<128x128xf32>
    %cst_10 = arith.constant dense<0.000000e+00> : vector<128xf32>
    %26 = vector.multi_reduction <add>, %25, %cst_10 [1] : vector<128x128xf32> to vector<128xf32>
    %27 = vector.shape_cast %26 : vector<128xf32> to vector<128x1xf32>
    %cst_11 = arith.constant 7.812500e-03 : f32
    %28 = vector.broadcast %cst_11 : f32 to vector<128x1xf32>
    %29 = arith.mulf %27, %28 : vector<128x1xf32>
    %cst_12 = arith.constant dense<0.000000e+00> : vector<128xf32>
    %30 = vector.multi_reduction <add>, %25, %cst_12 [0] : vector<128x128xf32> to vector<128xf32>
    %31 = vector.shape_cast %30 : vector<128xf32> to vector<1x128xf32>
    %cst_13 = arith.constant 7.812500e-03 : f32
    %32 = vector.broadcast %cst_13 : f32 to vector<1x128xf32>
    %33 = arith.mulf %31, %32 : vector<1x128xf32>
    %cst_14 = arith.constant dense<0.000000e+00> : vector<1xf32>
    %34 = vector.multi_reduction <add>, %33, %cst_14 [1] : vector<1x128xf32> to vector<1xf32>
    %35 = vector.shape_cast %34 : vector<1xf32> to vector<1x1xf32>
    %cst_15 = arith.constant 7.812500e-03 : f32
    %36 = vector.broadcast %cst_15 : f32 to vector<1x1xf32>
    %37 = arith.mulf %35, %36 : vector<1x1xf32>
    %38 = vector.broadcast %29 : vector<128x1xf32> to vector<128x128xf32>
    %39 = arith.subf %25, %38 : vector<128x128xf32>
    %40 = vector.broadcast %33 : vector<1x128xf32> to vector<128x128xf32>
    %41 = arith.subf %39, %40 : vector<128x128xf32>
    %42 = vector.broadcast %37 : vector<1x1xf32> to vector<128x128xf32>
    %43 = arith.addf %41, %42 : vector<128x128xf32>
    %c0_16 = arith.constant 0 : index
    %c0_17 = arith.constant 0 : index
    %c0_18 = arith.constant 0 : index
    %44 = vector.load %arg3[%c0_16, %c0_17, %c0_18] : memref<1x128x128xf32, #tpu.memory_space<vmem>>, vector<1x128x128xf32>
    %45 = vector.shape_cast %44 : vector<1x128x128xf32> to vector<128x128xf32>
    %46 = vector.shape_cast %43 : vector<128x128xf32> to vector<1x128x128xf32>
    tpu.vector_store %arg3[%c0_16, %c0_17, %c0_18], %46 {strides = array<i32>} : memref<1x128x128xf32, #tpu.memory_space<vmem>>, vector<1x128x128xf32>,
    return
  }
  func.func @transform_0(%arg0: i32) -> (i32, i32) {
    %c0_i32 = arith.constant 0 : i32
    %c0_i32_0 = arith.constant 0 : i32
    %c0_i32_1 = arith.constant 0 : i32
    return %c0_i32, %c0_i32_0 : i32, i32
  }
  func.func @transform_1(%arg0: i32) -> (i32, i32, i32) {
    %c0_i32 = arith.constant 0 : i32
    %c0_i32_0 = arith.constant 0 : i32
    %c0_i32_1 = arith.constant 0 : i32
    return %arg0, %c0_i32, %c0_i32_0 : i32, i32, i32
  }
  func.func @transform_2(%arg0: i32) -> (i32, i32, i32) {
    %c0_i32 = arith.constant 0 : i32
    %c0_i32_0 = arith.constant 0 : i32
    %c0_i32_1 = arith.constant 0 : i32
    return %arg0, %c0_i32, %c0_i32_0 : i32, i32, i32
  }
}

</mosaic_0001>

<bundles_post_ra>
// kernel: tpu_custom_call.1
= control target key start
LH: loop header
LB: loop body
LE: loop exit
PB: predicated region body
PF: predicated region fallthrough
CT: control target
= control target key end

     0   :  { %s1836_s0 = inlined_call_operand.<no memory space> [shape: f32[1,1], index: 0, kind: input, shape index: {}]   ;;  %s1837_s1 = inlined_call_operand.vmem [shape: f32[2,128,64], index: 1, kind: input, shape index: {}]   ;;  %s1838_s2 = inlined_call_operand.hbm [shape: f32[2,128,128], index: 2, kind: output, shape index: {}]  }
   0x1   :  { %7 = sst [smem:[#allocation2]] %s1836_s0 }
   0x2   :  { %8 = vsyncpa [#allocation4], 0 }
   0x3   :  { %10 = vsyncpa [#allocation4 + $0x1], 0  ;;  %s1133_s11 = smov 0   ;;  %s1135_s12 = smov 0  }
   0x4   :  { %s1137_s13 = smov 0   ;;  %s1139_s14 = smov 0  }
   0x5 LB: > { %s1154_s0 = sadd.s32 4294967295, %s1111_s14   ;;  %s882_s15 = sadd.s32 4294967294, %s1111_s14   ;;  %s1111_s14 = sphi %s1139_s14, %s1844_s14   ;;  %s1107_s13 = sphi %s1137_s13, %s1843_s13   ;;  %s1103_s12 = sphi %s1135_s12, %s1842_s12   ;;  %s1099_s11 = sphi %s1133_s11, %s1841_s11  }
   0x6   : > { %s1158_s16 = sadd.s32 1, %s1111_s14   ;;  %s70_s17 = sadd.s32 1, %s1107_s13 }
   0x7   : > { %s67_s18 = ssub.s32 %s1111_s14, %s1158_s16  ;;  %p80_p0 = scmp.ne.s32.totalorder %s1107_s13, %s1103_s12 }
   0x8   : > { %p68_p1 = scmp.eq.s32.totalorder %s67_s18, 0  ;;  %p81_p2 = scmp.eq.s32.totalorder %s1154_s0, 1 }
   0x9   : > { %p86_p3 = scmp.ne.s32.totalorder %s1103_s12, %s1099_s11  ;;  %p87_p4 = scmp.eq.s32.totalorder %s882_s15, 1 }
   0xa   : > { %s1169_s19 = scalar_select %p68_p1, %s1107_s13, %s70_s17  }
   0xb   : > { %p1171_p5 = por %p81_p2, %p80_p0  ;;  %p1175_p6 = por %p87_p4, %p86_p3 }
   0xc   : > { %p885_p7 = scmp.ge.s32.totalorder %s1111_s14, 1  ;;  %p116_p8 = scmp.lt.s32.totalorder %s1111_s14, 3 }
   0xe   : > { %p117_p9 = pnand %p885_p7, %p116_p8 }
   0xf   : > { %p138_p10 = scmp.lt.s32.totalorder (!%p117_p9), %s1154_s0, 1  ;;  %s441_s27 = sld [smem:[#allocation2]] (!%p117_p9) }
  0x10   : > { %120 = sbr.rel (%p117_p9) target bundleno = 587 (0x24b), region = 28  ;;  %s135_s28 = sand.u32 (!%p117_p9), 1, %s1103_s12  }
  0x11   : > { %s886_s29 = sshll.u32 (!%p117_p9), %s135_s28, 7  ;;  %s927_s3 = sshll.u32 (!%p117_p9), %s1154_s0, 7 }
  0x12   : > { %s1770_s30 = scalar_lea.vmem (!%p117_p9), [#allocation3], %s886_s29  ;;  %s816_s6 = scalar_lea.hbm (!%p117_p9), %s1838_s2, %s927_s3 }
  0x13   : > { %s817_s7 = sshll.u32 (!%p117_p9), %s1770_s30, 4  ;;  %s819_s8 = sshll.u32 (!%p117_p9), %s816_s6, 4  ;;  %s818_s7 = int_to_ptr.vmem [resolvable:$true] %s817_s7  ;;  %s820_s8 = int_to_ptr.hbm [resolvable:$true] %s819_s8 }
  0x14   : > { %s805_s9 = scalar_lea.sflag (!%p117_p9), [#allocation4], %s135_s28  ;;  %s1063_s10 = sshra.s32 (!%p117_p9), %s820_s8, 4  ;;  %s1064_s10 = int_to_ptr.hbm [resolvable:$true] %s1063_s10 }
  0x15   : > { %s139_s22 = scalar_select %p138_p10, %s1154_s0, 1  ;;  %vm159_vm0 = vcmask 523264   ;;  %v273_v16 = vlaneseq }
  0x16   : > { %s1065_s0 = scalar_lea.hbm %s1064_s10, 128  ;;  %s1069_s18 = scalar_lea.hbm %s1838_s2, 256 }
  0x17   : > { %s926_s23 = sshll.u32 %s139_s22, 7  ;;  %v1326_v17 = vshrl.u32 %v273_v16, 7  ;;  %v1329_v19 = vand.u32 127, %v273_v16  ;;  %p1066_p11 = scmp.ne.s32.totalorder %s1064_s10, %s1065_s0 }
  0x18   : > { %s1186_s26 = scalar_lea.vmem %s1837_s1, %s926_s23  ;;  %p1070_p0 = scmp.lt.s32.totalorder %s1064_s10, %s1838_s2 }
  0x19   : > { %v1189_v0 = vld [vmem:[%s1186_s26 + $0x78] sm:$0xff]  ;;  %v1198_v1 = vld [vmem:[%s1186_s26 + $0x70] sm:$0xff]  ;;  %v1209_v2 = vld [vmem:[%s1186_s26 + $0x68] sm:$0xff]  ;;  %v278_v18 = vadd.s32 32, %v1326_v17  ;;  %vm292_vm2 = vcmp.eq.s32.totalorder %v1326_v17, %v1329_v19  ;;  %v279_v24 = vadd.s32 40, %v1326_v17  ;;  %v275_v25 = vadd.s32 8, %v1326_v17  ;;  %p1067_p12 = pnand %p1066_p11, %p1171_p5  ;;  %p1071_p1 = scmp.lt.s32.totalorder %s1069_s18, %s1065_s0 }
  0x1a   : > { %889 = vmatpush.xpose.msk.msra.mxu0 %vm159_vm0, %v1189_v0  ;;  %928 = vmatpush.xpose.msk.msra.mxu1 %vm159_vm0, %v1189_v0  ;;  %v1220_v3 = vld [vmem:[%s1186_s26 + $0x60] sm:$0xff]  ;;  %v1231_v4 = vld [vmem:[%s1186_s26 + $0x58] sm:$0xff]  ;;  %v1242_v5 = vld [vmem:[%s1186_s26 + $0x50] sm:$0xff]  ;;  %v282_v30 = vadd.s32 64, %v1326_v17  ;;  %v280_v34 = vadd.s32 48, %v1326_v17  ;;  %v276_v35 = vadd.s32 16, %v1326_v17 }
  0x1b   : > { %929 = vmatpush.xpose.msk.msra.mxu2 %vm159_vm0, %v1189_v0  ;;  %930 = vmatpush.xpose.msk.msra.mxu3 %vm159_vm0, %v1189_v0  ;;  %v152_v6 = vld [vmem:[%s1186_s26 + $0x48] sm:$0xff]  ;;  %v151_v7 = vld [vmem:[%s1186_s26 + $0x40] sm:$0xff]  ;;  %v150_v8 = vld [vmem:[%s1186_s26 + $0x38] sm:$0xff]  ;;  %vm296_vm1 = vcmp.eq.s32.totalorder %v278_v18, %v1329_v19  ;;  %vm297_vm3 = vcmp.eq.s32.totalorder %v279_v24, %v1329_v19  ;;  %vm293_vm4 = vcmp.eq.s32.totalorder %v275_v25, %v1329_v19  ;;  %v283_v41 = vadd.s32 72, %v1326_v17  ;;  %p1068_p13 = pneg %p1067_p12  ;;  %p1072_p2 = por %p1071_p1, %p1070_p0 }
  0x1c   : > { %v149_v9 = vld [vmem:[%s1186_s26 + $0x30] sm:$0xff]  ;;  %v148_v10 = vld [vmem:[%s1186_s26 + $0x28] sm:$0xff]  ;;  %v147_v11 = vld [vmem:[%s1186_s26 + $0x20] sm:$0xff]  ;;  %vm300_vm5 = vcmp.eq.s32.totalorder %v282_v30, %v1329_v19  ;;  %vm298_vm6 = vcmp.eq.s32.totalorder %v280_v34, %v1329_v19  ;;  %vm294_vm7 = vcmp.eq.s32.totalorder %v276_v35, %v1329_v19  ;;  %v277_v44 = vadd.s32 24, %v1326_v17 }
  0x1d   : > { %v146_v12 = vld [vmem:[%s1186_s26 + $0x18] sm:$0xff]  ;;  %v145_v13 = vld [vmem:[%s1186_s26 + $0x10] sm:$0xff]  ;;  %v144_v14 = vld [vmem:[%s1186_s26 + $0x8] sm:$0xff]  ;;  %vm301_vm8 = vcmp.eq.s32.totalorder %v283_v41, %v1329_v19  ;;  %v286_v49 = vadd.s32 96, %v1326_v17  ;;  %v281_v50 = vadd.s32 56, %v1326_v17  ;;  %v285_v52 = vadd.s32 88, %v1326_v17  ;;  %p1073_p3 = pnand %p1072_p2, %p1068_p13 }
  0x1e   : > { %890 = vmatpush.xpose.msk.msra.mxu0 %vm159_vm0, %v1198_v1  ;;  %931 = vmatpush.xpose.msk.msra.mxu1 %vm159_vm0, %v1198_v1  ;;  %v143_v15 = vld [vmem:[%s1186_s26] sm:$0xff]  ;;  %vm295_vm9 = vcmp.eq.s32.totalorder %v277_v44, %v1329_v19  ;;  %v284_v58 = vadd.s32 80, %v1326_v17  ;;  %v288_v62 = vadd.s32 112, %v1326_v17  ;;  %v1416_v41 = vstv %s441_s27 }
  0x1f   : > { %932 = vmatpush.xpose.msk.msra.mxu2 %vm159_vm0, %v1198_v1  ;;  %933 = vmatpush.xpose.msk.msra.mxu3 %vm159_vm0, %v1198_v1  ;;  %vm304_vm10 = vcmp.eq.s32.totalorder %v286_v49, %v1329_v19  ;;  %vm299_vm11 = vcmp.eq.s32.totalorder %v281_v50, %v1329_v19  ;;  %vm303_vm12 = vcmp.eq.s32.totalorder %v285_v52, %v1329_v19 }
  0x20   : > { %vm302_vm13 = vcmp.eq.s32.totalorder %v284_v58, %v1329_v19  ;;  %vm306_vm14 = vcmp.eq.s32.totalorder %v288_v62, %v1329_v19 }
  0x22   : > { %891 = vmatpush.xpose.msk.msra.mxu0 %vm159_vm0, %v1209_v2  ;;  %934 = vmatpush.xpose.msk.msra.mxu1 %vm159_vm0, %v1209_v2 }
  0x23   : > { %935 = vmatpush.xpose.msk.msra.mxu2 %vm159_vm0, %v1209_v2  ;;  %936 = vmatpush.xpose.msk.msra.mxu3 %vm159_vm0, %v1209_v2 }
  0x26   : > { %892 = vmatpush.xpose.msk.msra.mxu0 %vm159_vm0, %v1220_v3  ;;  %937 = vmatpush.xpose.msk.msra.mxu1 %vm159_vm0, %v1220_v3 }
  0x27   : > { %938 = vmatpush.xpose.msk.msra.mxu2 %vm159_vm0, %v1220_v3  ;;  %939 = vmatpush.xpose.msk.msra.mxu3 %vm159_vm0, %v1220_v3 }
  0x2a   : > { %893 = vmatpush.xpose.msk.msra.mxu0 %vm159_vm0, %v1231_v4  ;;  %940 = vmatpush.xpose.msk.msra.mxu1 %vm159_vm0, %v1231_v4 }
  0x2b   : > { %941 = vmatpush.xpose.msk.msra.mxu2 %vm159_vm0, %v1231_v4  ;;  %942 = vmatpush.xpose.msk.msra.mxu3 %vm159_vm0, %v1231_v4 }
  0x2e   : > { %894 = vmatpush.xpose.msk.msra.mxu0 %vm159_vm0, %v1242_v5  ;;  %943 = vmatpush.xpose.msk.msra.mxu1 %vm159_vm0, %v1242_v5 }
  0x2f   : > { %944 = vmatpush.xpose.msk.msra.mxu2 %vm159_vm0, %v1242_v5  ;;  %945 = vmatpush.xpose.msk.msra.mxu3 %vm159_vm0, %v1242_v5 }
  0x32   : > { %895 = vmatpush.xpose.msk.msra.mxu0 %vm159_vm0, %v152_v6  ;;  %946 = vmatpush.xpose.msk.msra.mxu1 %vm159_vm0, %v152_v6 }
  0x33   : > { %947 = vmatpush.xpose.msk.msra.mxu2 %vm159_vm0, %v152_v6  ;;  %948 = vmatpush.xpose.msk.msra.mxu3 %vm159_vm0, %v152_v6 }
  0x36   : > { %896 = vmatpush.xpose.msk.msra.mxu0 %vm159_vm0, %v151_v7  ;;  %949 = vmatpush.xpose.msk.msra.mxu1 %vm159_vm0, %v151_v7 }
  0x37   : > { %950 = vmatpush.xpose.msk.msra.mxu2 %vm159_vm0, %v151_v7  ;;  %951 = vmatpush.xpose.msk.msra.mxu3 %vm159_vm0, %v151_v7 }
  0x3a   : > { %897 = vmatpush.xpose.msk.msra.mxu0 %vm159_vm0, %v150_v8  ;;  %952 = vmatpush.xpose.msk.msra.mxu1 %vm159_vm0, %v150_v8 }
  0x3b   : > { %953 = vmatpush.xpose.msk.msra.mxu2 %vm159_vm0, %v150_v8  ;;  %954 = vmatpush.xpose.msk.msra.mxu3 %vm159_vm0, %v150_v8 }
  0x3e   : > { %898 = vmatpush.xpose.msk.msra.mxu0 %vm159_vm0, %v149_v9  ;;  %955 = vmatpush.xpose.msk.msra.mxu1 %vm159_vm0, %v149_v9 }
  0x3f   : > { %956 = vmatpush.xpose.msk.msra.mxu2 %vm159_vm0, %v149_v9  ;;  %957 = vmatpush.xpose.msk.msra.mxu3 %vm159_vm0, %v149_v9 }
  0x42   : > { %899 = vmatpush.xpose.msk.msra.mxu0 %vm159_vm0, %v148_v10  ;;  %958 = vmatpush.xpose.msk.msra.mxu1 %vm159_vm0, %v148_v10 }
  0x43   : > { %959 = vmatpush.xpose.msk.msra.mxu2 %vm159_vm0, %v148_v10  ;;  %960 = vmatpush.xpose.msk.msra.mxu3 %vm159_vm0, %v148_v10 }
  0x46   : > { %900 = vmatpush.xpose.msk.msra.mxu0 %vm159_vm0, %v147_v11  ;;  %961 = vmatpush.xpose.msk.msra.mxu1 %vm159_vm0, %v147_v11 }
  0x47   : > { %962 = vmatpush.xpose.msk.msra.mxu2 %vm159_vm0, %v147_v11  ;;  %963 = vmatpush.xpose.msk.msra.mxu3 %vm159_vm0, %v147_v11 }
  0x4a   : > { %901 = vmatpush.xpose.msk.msra.mxu0 %vm159_vm0, %v146_v12  ;;  %964 = vmatpush.xpose.msk.msra.mxu1 %vm159_vm0, %v146_v12 }
  0x4b   : > { %965 = vmatpush.xpose.msk.msra.mxu2 %vm159_vm0, %v146_v12  ;;  %966 = vmatpush.xpose.msk.msra.mxu3 %vm159_vm0, %v146_v12 }
  0x4e   : > { %902 = vmatpush.xpose.msk.msra.mxu0 %vm159_vm0, %v145_v13  ;;  %967 = vmatpush.xpose.msk.msra.mxu1 %vm159_vm0, %v145_v13 }
  0x4f   : > { %968 = vmatpush.xpose.msk.msra.mxu2 %vm159_vm0, %v145_v13  ;;  %969 = vmatpush.xpose.msk.msra.mxu3 %vm159_vm0, %v145_v13 }
  0x52   : > { %903 = vmatpush.xpose.msk.msra.mxu0 %vm159_vm0, %v144_v14  ;;  %970 = vmatpush.xpose.msk.msra.mxu1 %vm159_vm0, %v144_v14 }
  0x53   : > { %971 = vmatpush.xpose.msk.msra.mxu2 %vm159_vm0, %v144_v14  ;;  %972 = vmatpush.xpose.msk.msra.mxu3 %vm159_vm0, %v144_v14 }
  0x56   : > { %904 = vmatpush.xpose.msk.msra.mxu0 %vm159_vm0, %v143_v15  ;;  %973 = vmatpush.xpose.msk.msra.mxu1 %vm159_vm0, %v143_v15 }
  0x57   : > { %974 = vmatpush.xpose.msk.msra.mxu2 %vm159_vm0, %v143_v15  ;;  %975 = vmatpush.xpose.msk.msra.mxu3 %vm159_vm0, %v143_v15 }
  0x59   : > { %905 = vmatmul.msk.f32.vlgmr.msra.gmra.mxu0 %vm159_vm0, %v143_v15  ;;  %909 = vmatmul.msk.f32.vlgmr.msra.gmra.mxu1 %vm159_vm0, %v147_v11  ;;  %v287_v11 = vadd.s32 104, %v1326_v17 }
  0x5a   : > { %913 = vmatmul.msk.f32.vlgmr.msra.gmra.mxu2 %vm159_vm0, %v151_v7  ;;  %917 = vmatmul.msk.f32.vlgmr.msra.gmra.mxu3 %vm159_vm0, %v1220_v3 }
  0x61   : > { %906 = vmatmul.msk.f32.gmra.mxu0 %vm159_vm0, %v144_v14  ;;  %910 = vmatmul.msk.f32.gmra.mxu1 %vm159_vm0, %v148_v10 }
  0x62   : > { %914 = vmatmul.msk.f32.gmra.mxu2 %vm159_vm0, %v152_v6  ;;  %918 = vmatmul.msk.f32.gmra.mxu3 %vm159_vm0, %v1209_v2 }
  0x69   : > { %907 = vmatmul.msk.f32.gmra.mxu0 %vm159_vm0, %v145_v13  ;;  %911 = vmatmul.msk.f32.gmra.mxu1 %vm159_vm0, %v149_v9 }
  0x6a   : > { %915 = vmatmul.msk.f32.gmra.mxu2 %vm159_vm0, %v1242_v5  ;;  %919 = vmatmul.msk.f32.gmra.mxu3 %vm159_vm0, %v1198_v1  ;;  %v289_v1 = vadd.s32 120, %v1326_v17 }
  0x6c   : > { %vm307_vm15 = vcmp.eq.s32.totalorder %v289_v1, %v1329_v19 }
  0x71   : > { %908 = vmatmul.msk.f32.gmra.mxu0 %vm159_vm0, %v146_v12  ;;  %912 = vmatmul.msk.f32.gmra.mxu1 %vm159_vm0, %v150_v8 }
  0x72   : > { %916 = vmatmul.msk.f32.gmra.mxu2 %vm159_vm0, %v1231_v4  ;;  %920 = vmatmul.msk.f32.gmra.mxu3 %vm159_vm0, %v1189_v0  ;;  %vm305_vm0 = vcmp.eq.s32.totalorder %v287_v11, %v1329_v19 }
  0xd6   : > { %v1334_v20 = vpop.f32.mrf.mxu0  ;;  %v1336_v21 = vpop.f32.mrf.mxu1 }
  0xd7   : > { %v312_v22 = vsel %vm296_vm1, %v1336_v21, 0.0  ;;  %v308_v23 = vsel %vm292_vm2, %v1334_v20, 0.0  ;;  %v393_v17 = vmul.f32 2.0, %v1334_v20  ;;  %v397_v19 = vmul.f32 2.0, %v1336_v21 }
  0xd8   : > { %332 = vadd.xlane.f32.xlu2 %v312_v22  ;;  %324 = vadd.xlane.f32.xlu0 %v308_v23 }
  0xdd   : > { %v1344_v26 = vpop.f32.mrf.mxu2  ;;  %v1346_v27 = vpop.f32.mrf.mxu3 }
  0xde   : > { %v1348_v28 = vpop.f32.mrf.mxu0  ;;  %v1350_v29 = vpop.f32.mrf.mxu1  ;;  %v316_v37 = vsel %vm300_vm5, %v1344_v26, 0.0  ;;  %v320_v60 = vsel %vm304_vm10, %v1346_v27, 0.0 }
  0xdf   : > { %v313_v31 = vsel %vm297_vm3, %v1350_v29, 0.0  ;;  %v309_v32 = vsel %vm293_vm4, %v1348_v28, 0.0  ;;  %v398_v20 = vmul.f32 2.0, %v1350_v29 }
  0xe0   : > { %334 = vadd.xlane.f32.xlu2 %v313_v31  ;;  %326 = vadd.xlane.f32.xlu0 %v309_v32  ;;  %v356_v33 = vadd.f32 %v309_v32, %v308_v23 }
  0xe5   : > { %v1360_v36 = vpop.f32.mrf.mxu2  ;;  %v1363_v38 = vpop.f32.mrf.mxu3 }
  0xe6   : > { %v1365_v39 = vpop.f32.mrf.mxu0  ;;  %v1367_v40 = vpop.f32.mrf.mxu1  ;;  %v317_v46 = vsel %vm301_vm8, %v1360_v36, 0.0  ;;  %v321_v13 = vsel %vm305_vm0, %v1363_v38, 0.0 }
  0xe7   : > { %v314_v42 = vsel %vm298_vm6, %v1367_v40, 0.0  ;;  %v310_v43 = vsel %vm294_vm7, %v1365_v39, 0.0  ;;  %v1434_v1 = vmul.f32 2.0, %v1367_v40 }
  0xe8   : > { %340 = vadd.xlane.f32.xlu2 %v316_v37  ;;  %336 = vadd.xlane.f32.xlu0 %v314_v42  ;;  %v357_v47 = vadd.f32 %v356_v33, %v310_v43 }
  0xe9   : > { %328 = vadd.xlane.f32.xlu1 %v310_v43 }
  0xed   : > { %v1375_v45 = vpop.f32.mrf.mxu2  ;;  %v1384_v54 = vpop.f32.mrf.mxu3 }
  0xee   : > { %v1378_v48 = vpop.f32.mrf.mxu0  ;;  %v1386_v56 = vpop.f32.mrf.mxu1  ;;  %v318_v5 = vsel %vm302_vm13, %v1375_v45, 0.0  ;;  %v322_v6 = vsel %vm306_vm14, %v1384_v54, 0.0 }
  0xef   : > { %v311_v51 = vsel %vm295_vm9, %v1378_v48, 0.0  ;;  %v315_v61 = vsel %vm299_vm11, %v1386_v56, 0.0 }
  0xf0   : > { %342 = vadd.xlane.f32.xlu0 %v317_v46  ;;  %v358_v53 = vadd.f32 %v357_v47, %v311_v51  ;;  %v394_v47 = vmul.f32 2.0, %v1348_v28 }
  0xf1   : > { %330 = vadd.xlane.f32.xlu1 %v311_v51 }
  0xf2   : > { %v359_v55 = vadd.f32 %v358_v53, %v312_v22 }
  0xf4   : > { %v360_v57 = vadd.f32 %v359_v55, %v313_v31 }
  0xf5   : > { %v1392_v59 = vpop.f32.mrf.mxu2  ;;  %v1401_v4 = vpop.f32.mrf.mxu3 }
  0xf6   : > { %v319_v63 = vsel %vm303_vm12, %v1392_v59, 0.0  ;;  %v361_v0 = vadd.f32 %v360_v57, %v314_v42  ;;  %v323_v8 = vsel %vm307_vm15, %v1401_v4, 0.0 }
  0xf7   : > { %346 = vadd.xlane.f32.xlu2 %v319_v63 }
  0xf8   : > { %348 = vadd.xlane.f32.xlu0 %v320_v60  ;;  %v362_v2 = vadd.f32 %v361_v0, %v315_v61 }
  0xf9   : > { %338 = vadd.xlane.f32.xlu1 %v315_v61  ;;  %v401_v61 = vmul.f32 2.0, %v1344_v26 }
  0xfa   : > { %v363_v3 = vadd.f32 %v362_v2, %v316_v37 }
  0xfc   : > { %v364_v7 = vadd.f32 %v363_v3, %v317_v46 }
  0xfe   : > { %v365_v9 = vadd.f32 %v364_v7, %v318_v5 }
  0xff   : > { %352 = vadd.xlane.f32.xlu2 %v322_v6 }
 0x100   : > { %354 = vadd.xlane.f32.xlu0 %v323_v8  ;;  %v366_v10 = vadd.f32 %v365_v9, %v319_v63 }
 0x101   : > { %344 = vadd.xlane.f32.xlu1 %v318_v5 }
 0x102   : > { %v367_v12 = vadd.f32 %v366_v10, %v320_v60 }
 0x104   : > { %v368_v14 = vadd.f32 %v367_v12, %v321_v13 }
 0x106   : > { %v369_v15 = vadd.f32 %v368_v14, %v322_v6 }
 0x108   : > { %v370_v16 = vadd.f32 %v369_v15, %v323_v8  ;;  %v395_v8 = vmul.f32 2.0, %v1365_v39 }
 0x109   : > { %350 = vadd.xlane.f32.xlu1 %v321_v13 }
 0x10a   : > { %v371_v18 = vrot.slane %v370_v16, 4 }
 0x10c   : > { %v372_v22 = vadd.f32 %v371_v18, %v370_v16 }
 0x10e   : > { %v373_v23 = vrot.slane %v372_v22, 2 }
 0x110   : > { %v374_v24 = vadd.f32 %v373_v23, %v372_v22 }
 0x112   : > { %v375_v25 = vrot.slane %v374_v24, 1 }
 0x114   : > { %v1410_v30 = vadd.f32 %v375_v25, %v374_v24  ;;  %v402_v24 = vmul.f32 2.0, %v1360_v36  ;;  %v1455_v25 = vmul.f32 2.0, %v1378_v48 }
 0x14b   : > { %v333_v31 = vpop.xlane.xlu2 %332  ;;  %v325_v32 = vpop.xlane.xlu0 %324 }
 0x14c   : > { %v381_v33 = vadd.f32 %v1410_v30, %v333_v31  ;;  %v377_v34 = vadd.f32 %v1410_v30, %v325_v32 }
 0x14e   : > { %v413_v35 = vsub.f32 %v381_v33, %v397_v19  ;;  %v409_v37 = vsub.f32 %v377_v34, %v393_v17 }
 0x150   : > { %v429_v42 = vmax.f32 %v413_v35, 0.0  ;;  %v425_v43 = vmax.f32 %v409_v37, 0.0 }
 0x152   : > { %v447_v44 = vmul.f32 %v1416_v41, %v429_v42  ;;  %v443_v46 = vmul.f32 %v1416_v41, %v425_v43 }
 0x153   : > { %v335_v49 = vpop.xlane.xlu2 %334  ;;  %v327_v21 = vpop.xlane.xlu0 %326 }
 0x154   : > { %v1422_v50 = vadd.f32 1e-05, %v447_v44  ;;  %v1424_v51 = vadd.f32 1e-05, %v443_v46  ;;  %v382_v52 = vadd.f32 %v1410_v30, %v335_v49  ;;  %v378_v53 = vadd.f32 %v1410_v30, %v327_v21 }
 0x156   : > { %v414_v55 = vsub.f32 %v382_v52, %v398_v20  ;;  %v410_v57 = vsub.f32 %v378_v53, %v394_v47  ;;  %1017 = vrsqrt.f32 %v1422_v50  ;;  %vm530_vm1 = vcmp.eq.f32.partialorder %v1422_v50, inf }
 0x157   : > { %1019 = vrsqrt.f32 %v1424_v51  ;;  %vm532_vm2 = vcmp.eq.f32.partialorder %v1422_v50, 0.0  ;;  %v533_v21 = vand.u32 2147483648, %v1422_v50  ;;  %vm482_vm3 = vcmp.eq.f32.partialorder %v1424_v51, inf }
 0x158   : > { %v430_v58 = vmax.f32 %v414_v55, 0.0  ;;  %v426_v28 = vmax.f32 %v410_v57, 0.0  ;;  %vm484_vm4 = vcmp.eq.f32.partialorder %v1424_v51, 0.0 }
 0x15a   : > { %v448_v29 = vmul.f32 %v1416_v41, %v430_v58  ;;  %v444_v60 = vmul.f32 %v1416_v41, %v426_v28  ;;  %v485_v28 = vand.u32 2147483648, %v1424_v51 }
 0x15b   : > { %v341_v62 = vpop.xlane.xlu2 %340  ;;  %v337_v63 = vpop.xlane.xlu0 %336 }
 0x15c   : > { %v1018_v0 = vpop.eup %1017  ;;  %v1436_v2 = vadd.f32 1e-05, %v444_v60  ;;  %v385_v3 = vadd.f32 %v1410_v30, %v341_v62  ;;  %v1440_v5 = vadd.f32 %v1410_v30, %v337_v63  ;;  %v329_v6 = vpop.xlane.xlu1 %328  ;;  %v1443_v9 = vadd.f32 1e-05, %v448_v29 }
 0x15d   : > { %v1020_v7 = vpop.eup %1019  ;;  %v379_v26 = vadd.f32 %v1410_v30, %v329_v6  ;;  %v524_v10 = vmul.f32 %v1018_v0, %v1422_v50  ;;  %v404_v60 = vmul.f32 2.0, %v1392_v59 }
 0x15e   : > { %v417_v11 = vsub.f32 %v385_v3, %v401_v61  ;;  %v415_v40 = vsub.f32 %v1440_v5, %v1434_v1  ;;  %v476_v12 = vmul.f32 %v1020_v7, %v1424_v51  ;;  %1021 = vrsqrt.f32 %v1436_v2 }
 0x15f   : > { %v411_v13 = vsub.f32 %v379_v26, %v395_v8  ;;  %v525_v14 = vmul.f32 %v1018_v0, %v524_v10  ;;  %1023 = vrsqrt.f32 %v1443_v9  ;;  %v405_v26 = vmul.f32 2.0, %v1346_v27 }
 0x160   : > { %v433_v15 = vmax.f32 %v417_v11, 0.0  ;;  %v477_v16 = vmul.f32 %v1020_v7, %v476_v12  ;;  %v1502_v11 = vmul.f32 2.0, %v1386_v56  ;;  %vm494_vm5 = vcmp.eq.f32.partialorder %v1436_v2, inf }
 0x161   : > { %v427_v18 = vmax.f32 %v411_v13, 0.0  ;;  %v526_v39 = vmul.f32 0.5, %v525_v14  ;;  %vm496_vm6 = vcmp.eq.f32.partialorder %v1436_v2, 0.0  ;;  %v408_v1 = vmul.f32 2.0, %v1401_v4 }
 0x162   : > { %v451_v22 = vmul.f32 %v1416_v41, %v433_v15  ;;  %v478_v23 = vmul.f32 0.5, %v477_v16  ;;  %v403_v15 = vmul.f32 2.0, %v1375_v45  ;;  %vm542_vm9 = vcmp.eq.f32.partialorder %v1443_v9, inf }
 0x163   : > { %v445_v31 = vmul.f32 %v1416_v41, %v427_v18  ;;  %v343_v32 = vpop.xlane.xlu0 %342  ;;  %v527_v17 = vsub.f32 1.5, %v526_v39  ;;  %vm544_vm10 = vcmp.eq.f32.partialorder %v1443_v9, 0.0 }
 0x164   : > { %v1022_v19 = vpop.eup %1021  ;;  %v1458_v33 = vadd.f32 1e-05, %v451_v22  ;;  %v386_v34 = vadd.f32 %v1410_v30, %v343_v32  ;;  %v331_v35 = vpop.xlane.xlu1 %330  ;;  %v479_v37 = vsub.f32 1.5, %v478_v23 }
 0x165   : > { %v1462_v42 = vadd.f32 1e-05, %v445_v31  ;;  %v1465_v36 = vadd.f32 %v1410_v30, %v331_v35  ;;  %v528_v48 = vmul.f32 %v1018_v0, %v527_v17  ;;  %v488_v43 = vmul.f32 %v1022_v19, %v1436_v2  ;;  %v1470_v47 = vpop.eup %1023 }
 0x166   : > { %v418_v44 = vsub.f32 %v386_v34, %v402_v24  ;;  %v480_v46 = vmul.f32 %v1020_v7, %v479_v37  ;;  %1025 = vrsqrt.f32 %v1458_v33  ;;  %v536_v57 = vmul.f32 %v1470_v47, %v1443_v9 }
 0x167   : > { %v412_v20 = vsub.f32 %v1465_v36, %v1455_v25  ;;  %v529_v49 = vmul.f32 %v528_v48, %v1422_v50  ;;  %v489_v52 = vmul.f32 %v1022_v19, %v488_v43  ;;  %1027 = vrsqrt.f32 %v1462_v42 }
 0x168   : > { %v434_v53 = vmax.f32 %v418_v44, 0.0  ;;  %v481_v55 = vmul.f32 %v480_v46, %v1424_v51  ;;  %v497_v31 = vand.u32 2147483648, %v1436_v2  ;;  %v431_v17 = vmax.f32 %v415_v40, 0.0 }
 0x169   : > { %v531_v58 = vsel %vm530_vm1, %v1422_v50, %v529_v49  ;;  %v490_v29 = vmul.f32 0.5, %v489_v52  ;;  %v407_v46 = vmul.f32 2.0, %v1384_v54  ;;  %vm578_vm7 = vcmp.eq.f32.partialorder %v1458_v33, inf }
 0x16a   : > { %v347_v61 = vpop.xlane.xlu2 %346  ;;  %v1488_v62 = vsel %vm532_vm2, %v533_v21, %v531_v58  ;;  %v483_v63 = vsel %vm482_vm3, %v1424_v51, %v481_v55  ;;  %v452_v0 = vmul.f32 %v1416_v41, %v434_v53  ;;  %v537_v51 = vmul.f32 %v1470_v47, %v536_v57 }
 0x16b   : > { %v388_v3 = vadd.f32 %v1410_v30, %v347_v61  ;;  %v349_v6 = vpop.xlane.xlu0 %348  ;;  %675 = vadd.xlane.f32.xlu2 %v1488_v62  ;;  %v1495_v7 = vsel %vm484_vm4, %v485_v28, %v483_v63  ;;  %v491_v8 = vsub.f32 1.5, %v490_v29  ;;  %v449_v55 = vmul.f32 %v1416_v41, %v431_v17 }
 0x16c   : > { %v1026_v59 = vpop.eup %1025  ;;  %v389_v50 = vadd.f32 %v1410_v30, %v349_v6  ;;  %v339_v10 = vpop.xlane.xlu1 %338  ;;  %667 = vadd.xlane.f32.xlu1 %v1495_v7  ;;  %v1512_v39 = vadd.f32 1e-05, %v452_v0  ;;  %v538_v45 = vmul.f32 0.5, %v537_v51  ;;  %vm580_vm8 = vcmp.eq.f32.partialorder %v1458_v33, 0.0 }
 0x16d   : > { %v420_v12 = vsub.f32 %v388_v3, %v404_v60  ;;  %v1505_v13 = vadd.f32 %v1410_v30, %v339_v10  ;;  %v492_v14 = vmul.f32 %v1022_v19, %v491_v8  ;;  %v572_v27 = vmul.f32 %v1026_v59, %v1458_v33  ;;  %v1510_v18 = vpop.eup %1027 }
 0x16e   : > { %v421_v16 = vsub.f32 %v389_v50, %v405_v26  ;;  %v500_v44 = vmul.f32 %v1510_v18, %v1462_v42  ;;  %1029 = vrsqrt.f32 %v1512_v39  ;;  %v539_v53 = vsub.f32 1.5, %v538_v45 }
 0x16f   : > { %v436_v22 = vmax.f32 %v420_v12, 0.0  ;;  %v416_v56 = vsub.f32 %v1505_v13, %v1502_v11  ;;  %v493_v23 = vmul.f32 %v492_v14, %v1436_v2  ;;  %v573_v32 = vmul.f32 %v1026_v59, %v572_v27 }
 0x170   : > { %v437_v24 = vmax.f32 %v421_v16, 0.0  ;;  %v501_v29 = vmul.f32 %v1510_v18, %v500_v44  ;;  %v540_v3 = vmul.f32 %v1470_v47, %v539_v53  ;;  %v581_v50 = vand.u32 2147483648, %v1458_v33 }
 0x171   : > { %v454_v19 = vmul.f32 %v1416_v41, %v436_v22  ;;  %v495_v34 = vsel %vm494_vm5, %v1436_v2, %v493_v23  ;;  %v574_v43 = vmul.f32 0.5, %v573_v32  ;;  %v428_v10 = vmax.f32 %v412_v20, 0.0 }
 0x172   : > { %v455_v35 = vmul.f32 %v1416_v41, %v437_v24  ;;  %v353_v37 = vpop.xlane.xlu2 %352  ;;  %v1525_v48 = vsel %vm496_vm6, %v497_v31, %v495_v34  ;;  %v502_v6 = vmul.f32 0.5, %v501_v29  ;;  %v406_v27 = vmul.f32 2.0, %v1363_v38 }
 0x173   : > { %v391_v5 = vadd.f32 %v1410_v30, %v353_v37  ;;  %v355_v40 = vpop.xlane.xlu0 %354  ;;  %669 = vadd.xlane.f32.xlu2 %v1525_v48  ;;  %v575_v52 = vsub.f32 1.5, %v574_v43  ;;  %v1538_v57 = vadd.f32 1e-05, %v454_v19  ;;  %v541_v25 = vmul.f32 %v540_v3, %v1443_v9 }
 0x174   : > { %v1534_v2 = vadd.f32 1e-05, %v455_v35  ;;  %v392_v49 = vadd.f32 %v1410_v30, %v355_v40  ;;  %v345_v21 = vpop.xlane.xlu1 %344  ;;  %v1547_v8 = vpop.eup %1029  ;;  %v503_v47 = vsub.f32 1.5, %v502_v6  ;;  %v1569_v20 = vadd.f32 1e-05, %v449_v55 }
 0x175   : > { %v423_v54 = vsub.f32 %v391_v5, %v407_v46  ;;  %v387_v4 = vadd.f32 %v1410_v30, %v345_v21  ;;  %v576_v28 = vmul.f32 %v1026_v59, %v575_v52  ;;  %v584_v36 = vmul.f32 %v1547_v8, %v1512_v39 }
 0x176   : > { %v424_v58 = vsub.f32 %v392_v49, %v408_v1  ;;  %1031 = vrsqrt.f32 %v1534_v2  ;;  %v446_v38 = vmul.f32 %v1416_v41, %v428_v10  ;;  %v504_v31 = vmul.f32 %v1510_v18, %v503_v47 }
 0x177   : > { %v439_v60 = vmax.f32 %v423_v54, 0.0  ;;  %v419_v61 = vsub.f32 %v387_v4, %v403_v15  ;;  %v577_v0 = vmul.f32 %v576_v28, %v1458_v33  ;;  %1033 = vrsqrt.f32 %v1538_v57 }
 0x178   : > { %v440_v63 = vmax.f32 %v424_v58, 0.0  ;;  %v585_v32 = vmul.f32 %v1547_v8, %v584_v36  ;;  %v432_v17 = vmax.f32 %v416_v56, 0.0  ;;  %v543_v35 = vsel %vm542_vm9, %v1443_v9, %v541_v25 }
 0x179   : > { %v457_v59 = vmul.f32 %v1416_v41, %v439_v60  ;;  %v435_v26 = vmax.f32 %v419_v61, 0.0  ;;  %v579_v12 = vsel %vm578_vm7, %v1458_v33, %v577_v0  ;;  %v545_v44 = vand.u32 2147483648, %v1443_v9 }
 0x17a   : > { %v1556_v51 = vmul.f32 %v1416_v41, %v440_v63  ;;  %v1561_v15 = vsel %vm580_vm8, %v581_v50, %v579_v12  ;;  %v586_v18 = vmul.f32 0.5, %v585_v32  ;;  %v1588_v1 = vadd.f32 1e-05, %v446_v38 }
 0x17b   : > { %v1559_v14 = vadd.f32 1e-05, %v457_v59  ;;  %v453_v22 = vmul.f32 %v1416_v41, %v435_v26  ;;  %683 = vadd.xlane.f32.xlu0 %v1561_v15  ;;  %v505_v11 = vmul.f32 %v504_v31, %v1462_v42  ;;  %vm506_vm11 = vcmp.eq.f32.partialorder %v1462_v42, inf }
 0x17c   : > { %v1032_v16 = vpop.eup %1031  ;;  %v351_v23 = vpop.xlane.xlu1 %350  ;;  %v1593_v5 = vsel %vm544_vm10, %v545_v44, %v543_v35  ;;  %v587_v49 = vsub.f32 1.5, %v586_v18  ;;  %v450_v52 = vmul.f32 %v1416_v41, %v432_v17  ;;  %vm508_vm12 = vcmp.eq.f32.partialorder %v1462_v42, 0.0 }
 0x17d   : > { %v390_v33 = vadd.f32 %v1410_v30, %v351_v23  ;;  %v620_v24 = vmul.f32 %v1032_v16, %v1534_v2  ;;  %1035 = vrsqrt.f32 %v1559_v14  ;;  %v1034_v45 = vpop.eup %1033  ;;  %v1582_v34 = vadd.f32 1e-05, %v453_v22 }
 0x17e   : > { %v608_v37 = vmul.f32 %v1034_v45, %v1538_v57  ;;  %1037 = vrsqrt.f32 %v1569_v20  ;;  %v509_v55 = vand.u32 2147483648, %v1462_v42  ;;  %v715_v58 = vadd.f32 %v1525_v48, %v1495_v7 }
 0x17f   : > { %v422_v19 = vsub.f32 %v390_v33, %v406_v27  ;;  %v621_v30 = vmul.f32 %v1032_v16, %v620_v24  ;;  %1039 = vrsqrt.f32 %v1582_v34  ;;  %v588_v61 = vmul.f32 %v1547_v8, %v587_v49 }
 0x180   : > { %v609_v13 = vmul.f32 %v1034_v45, %v608_v37  ;;  %1041 = vrsqrt.f32 %v1588_v1  ;;  %v1612_v0 = vadd.f32 1e-05, %v450_v52  ;;  %vm626_vm13 = vcmp.eq.f32.partialorder %v1534_v2, inf }
 0x181   : > { %v438_v43 = vmax.f32 %v422_v19, 0.0  ;;  %v622_v46 = vmul.f32 0.5, %v621_v30  ;;  %v629_v3 = vand.u32 2147483648, %v1534_v2  ;;  %vm628_vm14 = vcmp.eq.f32.partialorder %v1534_v2, 0.0 }
 0x182   : > { %v610_v9 = vmul.f32 0.5, %v609_v13  ;;  %v1622_v8 = vadd.f32 1e-05, %v1556_v51  ;;  %vm614_vm15 = vcmp.eq.f32.partialorder %v1538_v57, inf  ;;  %vm616_vm0 = vcmp.eq.f32.partialorder %v1538_v57, 0.0 }
 0x183   : > { %v456_v56 = vmul.f32 %v1416_v41, %v438_v43  ;;  %v623_v40 = vsub.f32 1.5, %v622_v46  ;;  %v1036_v21 = vpop.eup %1035  ;;  %677 = vadd.xlane.f32.xlu0 %v1593_v5  ;;  %v507_v41 = vsel %vm506_vm11, %v1462_v42, %v505_v11  ;;  %v617_v51 = vand.u32 2147483648, %v1538_v57 }
 0x184   : > { %v644_v4 = vmul.f32 %v1036_v21, %v1559_v14  ;;  %v611_v28 = vsub.f32 1.5, %v610_v9  ;;  %v1038_v29 = vpop.eup %1037  ;;  %v1626_v12 = vsel %vm508_vm12, %v509_v55, %v507_v41  ;;  %vm590_vm1 = vcmp.eq.f32.partialorder %v1512_v39, inf }
 0x185   : > { %v1599_v53 = vadd.f32 1e-05, %v456_v56  ;;  %v624_v54 = vmul.f32 %v1032_v16, %v623_v40  ;;  %v548_v50 = vmul.f32 %v1038_v29, %v1569_v20  ;;  %v1619_v10 = vpop.eup %1039  ;;  %vm592_vm2 = vcmp.eq.f32.partialorder %v1512_v39, 0.0 }
 0x186   : > { %v645_v63 = vmul.f32 %v1036_v21, %v644_v4  ;;  %v612_v6 = vmul.f32 %v1034_v45, %v611_v28  ;;  %v596_v22 = vmul.f32 %v1619_v10, %v1582_v34  ;;  %v1042_v23 = vpop.eup %1041  ;;  %v593_v24 = vand.u32 2147483648, %v1512_v39 }
 0x187   : > { %v625_v60 = vmul.f32 %v624_v54, %v1534_v2  ;;  %1043 = vrsqrt.f32 %v1599_v53  ;;  %v549_v27 = vmul.f32 %v1038_v29, %v548_v50  ;;  %v512_v31 = vmul.f32 %v1042_v23, %v1588_v1 }
 0x188   : > { %v646_v26 = vmul.f32 0.5, %v645_v63  ;;  %v613_v42 = vmul.f32 %v612_v6, %v1538_v57  ;;  %1045 = vrsqrt.f32 %v1612_v0  ;;  %v597_v33 = vmul.f32 %v1619_v10, %v596_v22 }
 0x189   : > { %v627_v59 = vsel %vm626_vm13, %v1534_v2, %v625_v60  ;;  %v589_v2 = vmul.f32 %v588_v61, %v1512_v39  ;;  %v550_v36 = vmul.f32 0.5, %v549_v27  ;;  %1047 = vrsqrt.f32 %v1622_v8 }
 0x18a   : > { %v1628_v47 = vsel %vm628_vm14, %v629_v3, %v627_v59  ;;  %v647_v16 = vsub.f32 1.5, %v646_v26  ;;  %vm650_vm3 = vcmp.eq.f32.partialorder %v1559_v14, inf  ;;  %v615_v19 = vsel %vm614_vm15, %v1538_v57, %v613_v42 }
 0x18b   : > { %691 = vadd.xlane.f32.xlu1 %v1628_v47  ;;  %671 = vadd.xlane.f32.xlu0 %v1626_v12  ;;  %v591_v32 = vsel %vm590_vm1, %v1512_v39, %v589_v2  ;;  %v551_v17 = vsub.f32 1.5, %v550_v36  ;;  %v598_v35 = vmul.f32 0.5, %v597_v33  ;;  %v513_v37 = vmul.f32 %v1042_v23, %v512_v31 }
 0x18c   : > { %v648_v45 = vmul.f32 %v1036_v21, %v647_v16  ;;  %v716_v18 = vadd.f32 %v715_v58, %v1626_v12  ;;  %vm652_vm4 = vcmp.eq.f32.partialorder %v1559_v14, 0.0  ;;  %v653_v43 = vand.u32 2147483648, %v1559_v14 }
 0x18d   : > { %v1044_v25 = vpop.eup %1043  ;;  %v552_v44 = vmul.f32 %v1038_v29, %v551_v17  ;;  %v1657_v11 = vsel %vm592_vm2, %v593_v24, %v591_v32  ;;  %vm554_vm5 = vcmp.eq.f32.partialorder %v1569_v20, inf  ;;  %v514_v56 = vmul.f32 0.5, %v513_v37 }
 0x18e   : > { %v632_v38 = vmul.f32 %v1044_v25, %v1599_v53  ;;  %v1046_v46 = vpop.eup %1045  ;;  %v1662_v40 = vsel %vm616_vm0, %v617_v51, %v615_v19  ;;  %v649_v49 = vmul.f32 %v648_v45, %v1559_v14  ;;  %vm556_vm6 = vcmp.eq.f32.partialorder %v1569_v20, 0.0 }
 0x18f   : > { %v553_v21 = vmul.f32 %v552_v44, %v1569_v20  ;;  %v560_v52 = vmul.f32 %v1046_v46, %v1612_v0  ;;  %v1048_v9 = vpop.eup %1047  ;;  %v599_v55 = vsub.f32 1.5, %v598_v35  ;;  %v515_v54 = vsub.f32 1.5, %v514_v56 }
 0x190   : > { %v633_v30 = vmul.f32 %v1044_v25, %v632_v38  ;;  %vm638_vm7 = vcmp.eq.f32.partialorder %v1599_v53, inf  ;;  %v557_v57 = vand.u32 2147483648, %v1569_v20  ;;  %v656_v58 = vmul.f32 %v1048_v9, %v1622_v8 }
 0x191   : > { %v561_v4 = vmul.f32 %v1046_v46, %v560_v52  ;;  %vm640_vm8 = vcmp.eq.f32.partialorder %v1599_v53, 0.0  ;;  %v641_v28 = vand.u32 2147483648, %v1599_v53  ;;  %v516_v29 = vmul.f32 %v1042_v23, %v515_v54 }
 0x192   : > { %v634_v13 = vmul.f32 0.5, %v633_v30  ;;  %v651_v60 = vsel %vm650_vm3, %v1559_v14, %v649_v49  ;;  %v555_v61 = vsel %vm554_vm5, %v1569_v20, %v553_v21  ;;  %v657_v3 = vmul.f32 %v1048_v9, %v656_v58 }
 0x193   : > { %685 = vadd.xlane.f32.xlu1 %v1657_v11  ;;  %689 = vadd.xlane.f32.xlu0 %v1662_v40  ;;  %v562_v63 = vmul.f32 0.5, %v561_v4  ;;  %v600_v59 = vmul.f32 %v1619_v10, %v599_v55  ;;  %v517_v26 = vmul.f32 %v516_v29, %v1588_v1  ;;  %vm518_vm9 = vcmp.eq.f32.partialorder %v1588_v1, inf }
 0x194   : > { %v635_v39 = vsub.f32 1.5, %v634_v13  ;;  %vm520_vm10 = vcmp.eq.f32.partialorder %v1588_v1, 0.0  ;;  %v521_v50 = vand.u32 2147483648, %v1588_v1  ;;  %v658_v16 = vmul.f32 0.5, %v657_v3 }
 0x195   : > { %v563_v2 = vsub.f32 1.5, %v562_v63  ;;  %v1689_v27 = vsel %vm652_vm4, %v653_v43, %v651_v60  ;;  %v1696_v10 = vsel %vm556_vm6, %v557_v57, %v555_v61  ;;  %v519_v23 = vsel %vm518_vm9, %v1588_v1, %v517_v26 }
 0x196   : > { %v636_v41 = vmul.f32 %v1044_v25, %v635_v39  ;;  %v1704_v51 = vsel %vm520_vm10, %v521_v50, %v519_v23  ;;  %v659_v25 = vsub.f32 1.5, %v658_v16  ;;  %v601_v20 = vmul.f32 %v600_v59, %v1582_v34 }
 0x197   : > { %v564_v14 = vmul.f32 %v1046_v46, %v563_v2  ;;  %v717_v36 = vadd.f32 %v716_v18, %v1704_v51  ;;  %vm566_vm11 = vcmp.eq.f32.partialorder %v1612_v0, inf  ;;  %vm602_vm12 = vcmp.eq.f32.partialorder %v1582_v34, inf }
 0x198   : > { %v637_v6 = vmul.f32 %v636_v41, %v1599_v53  ;;  %v569_v24 = vand.u32 2147483648, %v1612_v0  ;;  %v660_v38 = vmul.f32 %v1048_v9, %v659_v25  ;;  %v603_v31 = vsel %vm602_vm12, %v1582_v34, %v601_v20 }
 0x199   : > { %v565_v1 = vmul.f32 %v564_v14, %v1612_v0  ;;  %vm568_vm13 = vcmp.eq.f32.partialorder %v1612_v0, 0.0  ;;  %v605_v45 = vand.u32 2147483648, %v1582_v34  ;;  %vm604_vm14 = vcmp.eq.f32.partialorder %v1582_v34, 0.0 }
 0x19a   : > { %v639_v22 = vsel %vm638_vm7, %v1599_v53, %v637_v6  ;;  %v718_v53 = vadd.f32 %v717_v36, %v1488_v62  ;;  %v661_v35 = vmul.f32 %v660_v38, %v1622_v8  ;;  %vm662_vm15 = vcmp.eq.f32.partialorder %v1622_v8, inf }
 0x19b   : > { %v1701_v42 = vsel %vm640_vm8, %v641_v28, %v639_v22  ;;  %679 = vadd.xlane.f32.xlu1 %v1696_v10  ;;  %695 = vadd.xlane.f32.xlu0 %v1689_v27  ;;  %v567_v33 = vsel %vm566_vm11, %v1612_v0, %v565_v1  ;;  %v1724_v30 = vsel %vm604_vm14, %v605_v45, %v603_v31  ;;  %v665_v43 = vand.u32 2147483648, %v1622_v8 }
 0x19c   : > { %693 = vadd.xlane.f32.xlu2 %v1701_v42  ;;  %v719_v32 = vadd.f32 %v718_v53, %v1593_v5  ;;  %v1720_v17 = vsel %vm568_vm13, %v569_v24, %v567_v33  ;;  %v663_v18 = vsel %vm662_vm15, %v1622_v8, %v661_v35  ;;  %vm664_vm0 = vcmp.eq.f32.partialorder %v1622_v8, 0.0 }
 0x19d   : > { %v1737_v46 = vsel %vm664_vm0, %v665_v43, %v663_v18 }
 0x19e   : > { %v720_v19 = vadd.f32 %v719_v32, %v1696_v10 }
 0x1a0   : > { %v721_v0 = vadd.f32 %v720_v19, %v1720_v17 }
 0x1a2   : > { %v722_v37 = vadd.f32 %v721_v0, %v1561_v15 }
 0x1a3   : > { %673 = vadd.xlane.f32.xlu1 %v1704_v51 }
 0x1a4   : > { %687 = vadd.xlane.f32.xlu2 %v1724_v30  ;;  %v723_v34 = vadd.f32 %v722_v37, %v1657_v11 }
 0x1a6   : > { %v724_v44 = vadd.f32 %v723_v34, %v1724_v30 }
 0x1a8   : > { %v725_v13 = vadd.f32 %v724_v44, %v1662_v40 }
 0x1aa   : > { %v726_v56 = vadd.f32 %v725_v13, %v1628_v47 }
 0x1ab   : > { %697 = vadd.xlane.f32.xlu1 %v1737_v46 }
 0x1ac   : > { %681 = vadd.xlane.f32.xlu2 %v1720_v17  ;;  %v727_v49 = vadd.f32 %v726_v56, %v1701_v42 }
 0x1ae   : > { %v728_v21 = vadd.f32 %v727_v49, %v1689_v27 }
 0x1b0   : > { %v729_v52 = vadd.f32 %v728_v21, %v1737_v46 }
 0x1b2   : > { %v730_v9 = vrot.slane %v729_v52, 4 }
 0x1b4   : > { %v731_v8 = vadd.f32 %v730_v9, %v729_v52 }
 0x1b6   : > { %v732_v39 = vrot.slane %v731_v8, 2 }
 0x1b8   : > { %v733_v55 = vadd.f32 %v732_v39, %v731_v8 }
 0x1ba   : > { %v734_v54 = vrot.slane %v733_v55, 1 }
 0x1bc   : > { %v735_v57 = vadd.f32 %v734_v54, %v733_v55 }
 0x1be   : > { %v1746_v4 = vmul.f32 0.0078125, %v735_v57 }
 0x1c0   : > { %737 = vadd.xlane.f32.xlu2 %v1746_v4 }
 0x1de   : > { %v676_v58 = vpop.xlane.xlu2 %675 }
 0x1df   : > { %v668_v41 = vpop.xlane.xlu1 %667  ;;  %v703_v2 = vmul.f32 0.0078125, %v676_v58 }
 0x1e0   : > { %v699_v22 = vmul.f32 0.0078125, %v668_v41 }
 0x1e1   : > { %v744_v36 = vsub.f32 %v1488_v62, %v703_v2 }
 0x1e2   : > { %v740_v1 = vsub.f32 %v1495_v7, %v699_v22 }
 0x1e3   : > { %v760_v19 = vsub.f32 %v744_v36, %v1746_v4 }
 0x1e4   : > { %v756_v35 = vsub.f32 %v740_v1, %v1746_v4 }
 0x1e6   : > { %v670_v29 = vpop.xlane.xlu2 %669 }
 0x1e7   : > { %v700_v23 = vmul.f32 0.0078125, %v670_v29 }
 0x1e9   : > { %v741_v53 = vsub.f32 %v1525_v48, %v700_v23 }
 0x1eb   : > { %v757_v62 = vsub.f32 %v741_v53, %v1746_v4 }
 0x1ee   : > { %v684_v60 = vpop.xlane.xlu0 %683 }
 0x1ef   : > { %v707_v31 = vmul.f32 0.0078125, %v684_v60 }
 0x1f6   : > { %v678_v3 = vpop.xlane.xlu0 %677 }
 0x1f7   : > { %v704_v33 = vmul.f32 0.0078125, %v678_v3 }
 0x1f9   : > { %v745_v7 = vsub.f32 %v1593_v5, %v704_v33 }
 0x1fb   : > { %v761_v8 = vsub.f32 %v745_v7, %v1746_v4 }
 0x1fe   : > { %v692_v28 = vpop.xlane.xlu1 %691  ;;  %v672_v26 = vpop.xlane.xlu0 %671 }
 0x1ff   : > { %v701_v25 = vmul.f32 0.0078125, %v672_v26  ;;  %v711_v49 = vmul.f32 0.0078125, %v692_v28 }
 0x201   : > { %v742_v24 = vsub.f32 %v1626_v12, %v701_v25 }
 0x203   : > { %v758_v37 = vsub.f32 %v742_v24, %v1746_v4 }
 0x206   : > { %v686_v63 = vpop.xlane.xlu1 %685  ;;  %v690_v14 = vpop.xlane.xlu0 %689 }
 0x207   : > { %v708_v48 = vmul.f32 0.0078125, %v686_v63  ;;  %v710_v43 = vmul.f32 0.0078125, %v690_v14 }
 0x209   : > { %v749_v39 = vsub.f32 %v1657_v11, %v708_v48 }
 0x20e   : > { %v680_v59 = vpop.xlane.xlu1 %679  ;;  %v696_v44 = vpop.xlane.xlu0 %695 }
 0x20f   : > { %v694_v61 = vpop.xlane.xlu2 %693  ;;  %v705_v38 = vmul.f32 0.0078125, %v680_v59  ;;  %v713_v54 = vmul.f32 0.0078125, %v696_v44 }
 0x211   : > { %v746_v12 = vsub.f32 %v1696_v10, %v705_v38  ;;  %v712_v10 = vmul.f32 0.0078125, %v694_v61  ;;  %v765_v61 = vsub.f32 %v749_v39, %v1746_v4 }
 0x213   : > { %v753_v63 = vsub.f32 %v1701_v42, %v712_v10 }
 0x216   : > { %v674_v16 = vpop.xlane.xlu1 %673 }
 0x217   : > { %v688_v6 = vpop.xlane.xlu2 %687  ;;  %v702_v20 = vmul.f32 0.0078125, %v674_v16 }
 0x218   : > { %v709_v18 = vmul.f32 0.0078125, %v688_v6 }
 0x219   : > { %v743_v32 = vsub.f32 %v1704_v51, %v702_v20  ;;  %v748_v51 = vsub.f32 %v1561_v15, %v707_v31  ;;  %v762_v15 = vsub.f32 %v746_v12, %v1746_v4 }
 0x21a   : > { %v750_v57 = vsub.f32 %v1724_v30, %v709_v18  ;;  %v752_v30 = vsub.f32 %v1628_v47, %v711_v49 }
 0x21b   : > { %v759_v13 = vsub.f32 %v743_v32, %v1746_v4  ;;  %v764_v29 = vsub.f32 %v748_v51, %v1746_v4 }
 0x21c   : > { %v766_v6 = vsub.f32 %v750_v57, %v1746_v4  ;;  %v768_v42 = vsub.f32 %v752_v30, %v1746_v4 }
 0x21e   : > { %v698_v21 = vpop.xlane.xlu1 %697 }
 0x21f   : > { %v682_v50 = vpop.xlane.xlu2 %681  ;;  %v714_v41 = vmul.f32 0.0078125, %v698_v21 }
 0x220   : > { %v706_v45 = vmul.f32 0.0078125, %v682_v50 }
 0x221   : > { %v755_v26 = vsub.f32 %v1737_v46, %v714_v41 }
 0x222   : > { %v747_v56 = vsub.f32 %v1720_v17, %v706_v45  ;;  %v751_v17 = vsub.f32 %v1662_v40, %v710_v43  ;;  %v754_v40 = vsub.f32 %v1689_v27, %v713_v54  ;;  %v769_v27 = vsub.f32 %v753_v63, %v1746_v4 }
 0x223   : > { %v771_v23 = vsub.f32 %v755_v26, %v1746_v4 }
 0x224   : > { %v763_v11 = vsub.f32 %v747_v56, %v1746_v4  ;;  %v767_v47 = vsub.f32 %v751_v17, %v1746_v4  ;;  %v770_v46 = vsub.f32 %v754_v40, %v1746_v4 }
 0x233   : > { %v738_v0 = vpop.xlane.xlu2 %737 }
 0x234   : > { %v739_v34 = vmul.f32 0.0078125, %v738_v0 }
 0x236   : > { %v772_v52 = vadd.f32 %v756_v35, %v739_v34  ;;  %v773_v5 = vadd.f32 %v757_v62, %v739_v34  ;;  %v774_v9 = vadd.f32 %v758_v37, %v739_v34  ;;  %v775_v55 = vadd.f32 %v759_v13, %v739_v34 }
 0x237   : > { %v776_v58 = vadd.f32 %v760_v19, %v739_v34  ;;  %v777_v28 = vadd.f32 %v761_v8, %v739_v34  ;;  %v778_v60 = vadd.f32 %v762_v15, %v739_v34  ;;  %v779_v3 = vadd.f32 %v763_v11, %v739_v34 }
 0x238   : > { %788 = vst [vmem:[%s1770_s30] sm:$0xff] %v772_v52  ;;  %v780_v59 = vadd.f32 %v764_v29, %v739_v34  ;;  %v781_v50 = vadd.f32 %v765_v61, %v739_v34  ;;  %v782_v2 = vadd.f32 %v766_v6, %v739_v34  ;;  %v783_v16 = vadd.f32 %v767_v47, %v739_v34 }
 0x239   : > { %789 = vst [vmem:[%s1770_s30 + $0x8] sm:$0xff] %v773_v5  ;;  %v784_v22 = vadd.f32 %v768_v42, %v739_v34  ;;  %v785_v14 = vadd.f32 %v769_v27, %v739_v34  ;;  %v786_v25 = vadd.f32 %v770_v46, %v739_v34  ;;  %v787_v20 = vadd.f32 %v771_v23, %v739_v34 }
 0x23a   : > { %790 = vst [vmem:[%s1770_s30 + $0x10] sm:$0xff] %v774_v9 }
 0x23b   : > { %791 = vst [vmem:[%s1770_s30 + $0x18] sm:$0xff] %v775_v55 }
 0x23c   : > { %792 = vst [vmem:[%s1770_s30 + $0x20] sm:$0xff] %v776_v58 }
 0x23d   : > { %793 = vst [vmem:[%s1770_s30 + $0x28] sm:$0xff] %v777_v28 }
 0x23e   : > { %794 = vst [vmem:[%s1770_s30 + $0x30] sm:$0xff] %v778_v60 }
 0x23f   : > { %795 = vst [vmem:[%s1770_s30 + $0x38] sm:$0xff] %v779_v3 }
 0x240   : > { %796 = vst [vmem:[%s1770_s30 + $0x40] sm:$0xff] %v780_v59 }
 0x241   : > { %797 = vst [vmem:[%s1770_s30 + $0x48] sm:$0xff] %v781_v50 }
 0x242   : > { %798 = vst [vmem:[%s1770_s30 + $0x50] sm:$0xff] %v782_v2 }
 0x243   : > { %799 = vst [vmem:[%s1770_s30 + $0x58] sm:$0xff] %v783_v16 }
 0x244   : > { %800 = vst [vmem:[%s1770_s30 + $0x60] sm:$0xff] %v784_v22 }
 0x245   : > { %801 = vst [vmem:[%s1770_s30 + $0x68] sm:$0xff] %v785_v14 }
 0x246   : > { %802 = vst [vmem:[%s1770_s30 + $0x70] sm:$0xff] %v786_v25 }
 0x247   : > { %803 = vst [vmem:[%s1770_s30 + $0x78] sm:$0xff] %v787_v20 }
 0x248   : > { %1076 = shalt.err (!%p1073_p3)
}
 0x249   : > { %s1113_s24 = smov 128   ;;  %s1114_s25 = smov 8  }
 0x24a   : > { %976 = dma.vmem_to_hbm [thread:$0]  (%p1171_p5), %s818_s7, 2048, %s820_s8, %s805_s9, %s1113_s24, %s1113_s24, %s1114_s25  }
 0x24b PF: > { %p982_p4 = scmp.ge.s32.totalorder %s1111_s14, 2  ;;  %s834_s26 = sand.u32 1, %s1099_s11  }
 0x24c   : > { %s835_s27 = scalar_lea.sflag [#allocation4], %s834_s26 }
 0x24d   : > { %p979_p7 = pnand %p982_p4, %p1175_p6 }
 0x24f   : > { %p980_p8 = pneg %p979_p7 }
 0x251   : > { %1094 = dma.done.wait (%p980_p8), %s835_s27, 2048  }
 0x252   : > { %1096 = vsyncadd (%p980_p8), %s835_s27, 4294965248  ;;  %p13_p9 = scmp.ge.s32.totalorder %s1158_s16, 4   ;;  %s1841_s11 = smov %s1103_s12 }
 0x253   : > { %s1842_s12 = smov %s1107_s13  ;;  %s1843_s13 = smov %s1169_s19 }
 0x254   : > { %s1844_s14 = smov %s1158_s16  ;;  %15 = sbr.rel (!%p13_p9) target bundleno = 5 (0x5), region = 63 }
 0x259   :  { %841 = vsyncpa [#allocation4], 1 }
 0x25a   :  { %843 = vsyncpa [#allocation4 + $0x1], 1 }

</bundles_post_ra>
